<compile_context>
chip_gen: v5e
topology: v5e:2x2
jax: 0.10.0
libtpu: 0.0.40
codegen_flags: <defaults>
</compile_context>

<pallas_src>
import jax
import jax.numpy as jnp
from jax.experimental import pallas as pl
from jax.experimental.pallas import tpu as pltpu

K_IN = 784           # input features (28*28), sublane-aligned (784 % 8 == 0)
H = 128              # hidden width
N_OUT = 10           # logical output features
N_PAD = 128          # lane-dense output width
TB_DEFAULT = 512     # batch tile (multiple of 8; sweep 256-1024 per generation)


def _round_up(n, m):
    return ((n + m - 1) // m) * m


def _mlp_kernel(x_ref, w1_ref, b1_ref, w2_ref, b2_ref, o_ref):
    # Layer 1: (TB, 784) f32 -> bf16 cast (VPU) -> MXU bf16 matmul, f32 acc.
    x_bf = x_ref[...].astype(jnp.bfloat16)
    h = jnp.dot(x_bf, w1_ref[...], preferred_element_type=jnp.float32)
    h = jnp.maximum(h + b1_ref[...], 0.0)                       # bias + ReLU in f32
    # Layer 2: (TB, 128) bf16 @ (128, 128) bf16 -> f32 acc, bias in f32.
    out = jnp.dot(h.astype(jnp.bfloat16), w2_ref[...],
                  preferred_element_type=jnp.float32)
    o_ref[...] = out + b2_ref[...]


def simple_nn_forward(x, w1, b1, w2, b2, *, tb=TB_DEFAULT):
    """Mirror of SimpleNN.forward: x.view(-1, 784) -> Linear -> ReLU -> Linear."""
    x = x.reshape(-1, K_IN).astype(jnp.float32)
    B = x.shape[0]

    # --- wrapper-side prep (tiny arrays only; x is NOT copied unless B needs pad) ---
    w1_bf = w1.astype(jnp.bfloat16)                              # (784, 128)
    w2_bf = jnp.pad(w2.astype(jnp.bfloat16),
                    ((0, 0), (0, N_PAD - N_OUT)))                # (128, 128)
    b1_2d = b1.reshape(1, H).astype(jnp.float32)                 # (1, 128)
    b2_2d = jnp.pad(b2.reshape(1, N_OUT).astype(jnp.float32),
                    ((0, 0), (0, N_PAD - N_OUT)))                # (1, 128)

    # Batch tile: sublane-aligned; single tile for small batches, TB otherwise.
    tb = _round_up(tb, 8)
    tb_eff = min(tb, _round_up(B, 8))
    Bp = _round_up(B, tb_eff)
    x_p = x if Bp == B else jnp.pad(x, ((0, Bp - B), (0, 0)))

    grid = (Bp // tb_eff,)

    cost = pl.CostEstimate(
        flops=2 * Bp * K_IN * H + 2 * Bp * H * N_PAD,
        transcendentals=0,
        bytes_accessed=(x_p.size * 4 + w1_bf.size * 2 + w2_bf.size * 2
                        + b1_2d.size * 4 + b2_2d.size * 4 + Bp * N_PAD * 4),
    )

    out_padded = pl.pallas_call(
        _mlp_kernel,
        out_shape=jax.ShapeDtypeStruct((Bp, N_PAD), jnp.float32),
        grid_spec=pl.GridSpec(
            grid=grid,
            in_specs=[
                pl.BlockSpec((tb_eff, K_IN), lambda i: (i, 0)),  # x: batch-tiled
                pl.BlockSpec((K_IN, H), lambda i: (0, 0)),       # w1: VMEM-resident
                pl.BlockSpec((1, H), lambda i: (0, 0)),          # b1: VMEM-resident
                pl.BlockSpec((H, N_PAD), lambda i: (0, 0)),      # w2: VMEM-resident
                pl.BlockSpec((1, N_PAD), lambda i: (0, 0)),      # b2: VMEM-resident
            ],
            out_specs=pl.BlockSpec((tb_eff, N_PAD), lambda i: (i, 0)),
        ),
        compiler_params=pltpu.CompilerParams(
            dimension_semantics=("parallel",),   # shard batch tiles across TCs
        ),
        cost_estimate=cost,
    )(x_p, w1_bf, b1_2d, w2_bf, b2_2d)

    # Drop batch padding and the lane-padding of the 10-wide logits.
    return out_padded[:B, :N_OUT]


def init_params(key):
    """Deterministic init mimicking nn.Linear's default uniform(-1/sqrt(fan_in), +)."""
    k1, k2, k3, k4 = jax.random.split(key, 4)
    bound1 = 1.0 / jnp.sqrt(784.0)
    bound2 = 1.0 / jnp.sqrt(128.0)
    # Stored as (in, out) = transpose of PyTorch's (out, in) layout.
    w1 = jax.random.uniform(k1, (K_IN, H), jnp.float32, -bound1, bound1)
    b1 = jax.random.uniform(k2, (H,), jnp.float32, -bound1, bound1)
    w2 = jax.random.uniform(k3, (H, N_OUT), jnp.float32, -bound2, bound2)
    b2 = jax.random.uniform(k4, (N_OUT,), jnp.float32, -bound2, bound2)
    return w1, b1, w2, b2


if __name__ == "__main__":
    key = jax.random.PRNGKey(0)
    pkey, xkey = jax.random.split(key)
    w1, b1, w2, b2 = init_params(pkey)

    # Example input: batch=8 MNIST-like images, (8, 1, 28, 28) -> view(-1, 784)
    x = jax.random.normal(xkey, (8, 1, 28, 28), jnp.float32)

    fwd = jax.jit(simple_nn_forward)
    out = jax.block_until_ready(fwd(x, w1, b1, w2, b2))
    assert out.shape == (8, 10)
    assert bool(jnp.all(jnp.isfinite(out)))

    # Reference in plain JAX with the same bf16 input/weight quantization
    # (accumulation stays f32 in both, so this is a tight comparison).
    x2 = x.reshape(-1, K_IN)
    xq = x2.astype(jnp.bfloat16).astype(jnp.float32)
    w1q = w1.astype(jnp.bfloat16).astype(jnp.float32)
    w2q = w2.astype(jnp.bfloat16).astype(jnp.float32)
    h_ref = jnp.maximum(xq @ w1q + b1, 0.0)
    ref = h_ref.astype(jnp.bfloat16).astype(jnp.float32) @ w2q + b2
    assert jnp.allclose(out, ref, atol=2e-2, rtol=2e-2)

    # Loose sanity check against the full-f32 reference (bf16 quantization noise only).
    ref_f32 = jnp.maximum(x2 @ w1 + b1, 0.0) @ w2 + b2
    assert float(jnp.max(jnp.abs(out - ref_f32))) < 1e-1

    print("KERNEL_OK")
</pallas_src>

<mosaic_0001>
module attributes {stable_mosaic.version = 11 : i64} {
  func.func @_mlp_kernel(%arg0: i32, %arg1: memref<8x784xf32, #tpu.memory_space<vmem>>, %arg2: memref<784x128xbf16, #tpu.memory_space<vmem>>, %arg3: memref<1x128xf32, #tpu.memory_space<vmem>>, %arg4: memref<128x128xbf16, #tpu.memory_space<vmem>>, %arg5: memref<1x128xf32, #tpu.memory_space<vmem>>, %arg6: memref<8x128xf32, #tpu.memory_space<vmem>>) attributes {dimension_semantics = [#tpu.dimension_semantics<parallel>], iteration_bounds = array<i64: 1>, scalar_prefetch = 0 : i64, scratch_operands = 0 : i64, tpu.core_type = #tpu.core_type<tc>, window_params = [{transform_indices = @transform_0, window_bounds = array<i64: 8, 784>}, {pipeline_mode = #tpu.pipeline_mode<synchronous>, transform_indices = @transform_1, window_bounds = array<i64: 784, 128>}, {pipeline_mode = #tpu.pipeline_mode<synchronous>, transform_indices = @transform_2, window_bounds = array<i64: 1, 128>}, {pipeline_mode = #tpu.pipeline_mode<synchronous>, transform_indices = @transform_3, window_bounds = array<i64: 128, 128>}, {pipeline_mode = #tpu.pipeline_mode<synchronous>, transform_indices = @transform_4, window_bounds = array<i64: 1, 128>}, {transform_indices = @transform_5, window_bounds = array<i64: 8, 128>}]} {
    %c0 = arith.constant 0 : index
    %c0_0 = arith.constant 0 : index
    %0 = vector.load %arg1[%c0, %c0_0] : memref<8x784xf32, #tpu.memory_space<vmem>>, vector<8x784xf32>
    %1 = arith.truncf %0 : vector<8x784xf32> to vector<8x784xbf16>
    %c0_1 = arith.constant 0 : index
    %c0_2 = arith.constant 0 : index
    %2 = vector.load %arg2[%c0_1, %c0_2] : memref<784x128xbf16, #tpu.memory_space<vmem>>, vector<784x128xbf16>
    %cst = arith.constant dense<0.000000e+00> : vector<8x128xf32>
    %3 = tpu.matmul %1, %2, %cst {dimension_numbers = #tpu.dot_dimension_numbers<[1], [0], [0], [1], [0, 0, 1, 1], [], []>} : vector<8x784xbf16>, vector<784x128xbf16>, vector<8x128xf32> -> vector<8x128xf32>
    %c0_3 = arith.constant 0 : index
    %c0_4 = arith.constant 0 : index
    %4 = vector.load %arg3[%c0_3, %c0_4] : memref<1x128xf32, #tpu.memory_space<vmem>>, vector<1x128xf32>
    %5 = vector.broadcast %4 : vector<1x128xf32> to vector<8x128xf32>
    %6 = arith.addf %3, %5 : vector<8x128xf32>
    %cst_5 = arith.constant 0.000000e+00 : f32
    %7 = vector.broadcast %cst_5 : f32 to vector<8x128xf32>
    %8 = arith.maximumf %6, %7 : vector<8x128xf32>
    %9 = arith.truncf %8 : vector<8x128xf32> to vector<8x128xbf16>
    %c0_6 = arith.constant 0 : index
    %c0_7 = arith.constant 0 : index
    %10 = vector.load %arg4[%c0_6, %c0_7] : memref<128x128xbf16, #tpu.memory_space<vmem>>, vector<128x128xbf16>
    %cst_8 = arith.constant dense<0.000000e+00> : vector<8x128xf32>
    %11 = tpu.matmul %9, %10, %cst_8 {dimension_numbers = #tpu.dot_dimension_numbers<[1], [0], [0], [1], [0, 0, 1, 1], [], []>} : vector<8x128xbf16>, vector<128x128xbf16>, vector<8x128xf32> -> vector<8x128xf32>
    %c0_9 = arith.constant 0 : index
    %c0_10 = arith.constant 0 : index
    %12 = vector.load %arg5[%c0_9, %c0_10] : memref<1x128xf32, #tpu.memory_space<vmem>>, vector<1x128xf32>
    %13 = vector.broadcast %12 : vector<1x128xf32> to vector<8x128xf32>
    %14 = arith.addf %11, %13 : vector<8x128xf32>
    %c0_11 = arith.constant 0 : index
    %c0_12 = arith.constant 0 : index
    %15 = vector.load %arg6[%c0_11, %c0_12] : memref<8x128xf32, #tpu.memory_space<vmem>>, vector<8x128xf32>
    tpu.vector_store %arg6[%c0_11, %c0_12], %14 {strides = array<i32>} : memref<8x128xf32, #tpu.memory_space<vmem>>, vector<8x128xf32>,
    return
  }
  func.func @transform_0(%arg0: i32) -> (i32, i32) {
    %c0_i32 = arith.constant 0 : i32
    %c0_i32_0 = arith.constant 0 : i32
    return %arg0, %c0_i32 : i32, i32
  }
  func.func @transform_1(%arg0: i32) -> (i32, i32) {
    %c0_i32 = arith.constant 0 : i32
    %c0_i32_0 = arith.constant 0 : i32
    %c0_i32_1 = arith.constant 0 : i32
    return %c0_i32, %c0_i32_0 : i32, i32
  }
  func.func @transform_2(%arg0: i32) -> (i32, i32) {
    %c0_i32 = arith.constant 0 : i32
    %c0_i32_0 = arith.constant 0 : i32
    %c0_i32_1 = arith.constant 0 : i32
    return %c0_i32, %c0_i32_0 : i32, i32
  }
  func.func @transform_3(%arg0: i32) -> (i32, i32) {
    %c0_i32 = arith.constant 0 : i32
    %c0_i32_0 = arith.constant 0 : i32
    %c0_i32_1 = arith.constant 0 : i32
    return %c0_i32, %c0_i32_0 : i32, i32
  }
  func.func @transform_4(%arg0: i32) -> (i32, i32) {
    %c0_i32 = arith.constant 0 : i32
    %c0_i32_0 = arith.constant 0 : i32
    %c0_i32_1 = arith.constant 0 : i32
    return %c0_i32, %c0_i32_0 : i32, i32
  }
  func.func @transform_5(%arg0: i32) -> (i32, i32) {
    %c0_i32 = arith.constant 0 : i32
    %c0_i32_0 = arith.constant 0 : i32
    return %arg0, %c0_i32 : i32, i32
  }
}

</mosaic_0001>

<bundles_post_ra>
// kernel: simple_nn_forward.1
= control target key start
LH: loop header
LB: loop body
LE: loop exit
PB: predicated region body
PF: predicated region fallthrough
CT: control target
= control target key end

     0   :  { %s1174_s0 = inlined_call_operand.vmem [shape: f32[8,784], index: 0, kind: input, shape index: {}]   ;;  %s1175_s1 = inlined_call_operand.vmem [shape: bf16[784,128], index: 1, kind: input, shape index: {}]   ;;  %s1176_s2 = inlined_call_operand.vmem [shape: f32[1,128], index: 2, kind: input, shape index: {}]   ;;  %s1177_s3 = inlined_call_operand.vmem [shape: bf16[128,128], index: 3, kind: input, shape index: {}]   ;;  %s1178_s4 = inlined_call_operand.vmem [shape: f32[1,128], index: 4, kind: input, shape index: {}]   ;;  %s1179_s5 = inlined_call_operand.hbm [shape: f32[8,128], index: 5, kind: output, shape index: {}]  }
   0x1   :  { %v863_v0 = vld [vmem:[%s1175_s1 + $0x38] sm:$0xff]  ;;  %v862_v3 = vld [vmem:[%s1175_s1 + $0x30] sm:$0xff]  ;;  %v861_v8 = vld [vmem:[%s1175_s1 + $0x28] sm:$0xff] }
   0x2   :  { %v871_v1 = vld [vmem:[%s1175_s1 + $0x78] sm:$0xff]  ;;  %436 = vmatpush.bf16.msra.mxu0 %v863_v0  ;;  %v870_v4 = vld [vmem:[%s1175_s1 + $0x70] sm:$0xff]  ;;  %v869_v9 = vld [vmem:[%s1175_s1 + $0x68] sm:$0xff] }
   0x3   :  { %v879_v2 = vld [vmem:[%s1175_s1 + $0xb8] sm:$0xff]  ;;  %449 = vmatpush.bf16.msra.mxu1 %v871_v1  ;;  %v878_v5 = vld [vmem:[%s1175_s1 + $0xb0] sm:$0xff]  ;;  %v877_v10 = vld [vmem:[%s1175_s1 + $0xa8] sm:$0xff] }
   0x4   :  { %462 = vmatpush.bf16.msra.mxu2 %v879_v2  ;;  %v887_v6 = vld [vmem:[%s1175_s1 + $0xf8] sm:$0xff]  ;;  %v886_v7 = vld [vmem:[%s1175_s1 + $0xf0] sm:$0xff]  ;;  %v885_v11 = vld [vmem:[%s1175_s1 + $0xe8] sm:$0xff] }
   0x5   :  { %475 = vmatpush.bf16.msra.mxu3 %v887_v6  ;;  %v860_v12 = vld [vmem:[%s1175_s1 + $0x20] sm:$0xff]  ;;  %v859_v16 = vld [vmem:[%s1175_s1 + $0x18] sm:$0xff] }
   0x6   :  { %437 = vmatpush.bf16.msra.mxu0 %v862_v3  ;;  %v868_v13 = vld [vmem:[%s1175_s1 + $0x60] sm:$0xff]  ;;  %v867_v17 = vld [vmem:[%s1175_s1 + $0x58] sm:$0xff] }
   0x7   :  { %450 = vmatpush.bf16.msra.mxu1 %v870_v4  ;;  %v876_v14 = vld [vmem:[%s1175_s1 + $0xa0] sm:$0xff]  ;;  %v875_v18 = vld [vmem:[%s1175_s1 + $0x98] sm:$0xff] }
   0x8   :  { %463 = vmatpush.bf16.msra.mxu2 %v878_v5  ;;  %v884_v15 = vld [vmem:[%s1175_s1 + $0xe0] sm:$0xff] }
   0x9   :  { %476 = vmatpush.bf16.msra.mxu3 %v886_v7 }
   0xa   :  { %438 = vmatpush.bf16.msra.mxu0 %v861_v8 }
   0xb   :  { %451 = vmatpush.bf16.msra.mxu1 %v869_v9 }
   0xc   :  { %464 = vmatpush.bf16.msra.mxu2 %v877_v10 }
   0xd   :  { %477 = vmatpush.bf16.msra.mxu3 %v885_v11 }
   0xe   :  { %439 = vmatpush.bf16.msra.mxu0 %v860_v12 }
   0xf   :  { %452 = vmatpush.bf16.msra.mxu1 %v868_v13 }
  0x10   :  { %465 = vmatpush.bf16.msra.mxu2 %v876_v14 }
  0x11   :  { %10 = vsyncpa [#allocation3], 0  ;;  %478 = vmatpush.bf16.msra.mxu3 %v884_v15  ;;  %v883_v19 = vld [vmem:[%s1175_s1 + $0xd8] sm:$0xff]  ;;  %v858_v20 = vld [vmem:[%s1175_s1 + $0x10] sm:$0xff]  ;;  %vm432_vm0 = vcmask 130048   ;;  %s942_s21 = smov [#allocation2]  }
  0x12   :  { %440 = vmatpush.bf16.msra.mxu0 %v859_v16  ;;  %v866_v21 = vld [vmem:[%s1175_s1 + $0x50] sm:$0xff]  ;;  %v857_v24 = vld [vmem:[%s1175_s1 + $0x8] sm:$0xff]  ;;  %v856_v27 = vld [vmem:[%s1175_s1] sm:$0xff]  ;;  %s616_s22 = sshll.u32 %s942_s21, 4  ;;  %s618_s25 = sshll.u32 %s1179_s5, 4  ;;  %s617_s22 = int_to_ptr.vmem [resolvable:$true] %s616_s22  ;;  %s619_s25 = int_to_ptr.hbm [resolvable:$true] %s618_s25 }
  0x13   :  { %453 = vmatpush.bf16.msra.mxu1 %v867_v17  ;;  %v874_v22 = vld [vmem:[%s1175_s1 + $0x90] sm:$0xff]  ;;  %v865_v25 = vld [vmem:[%s1175_s1 + $0x48] sm:$0xff]  ;;  %v864_v29 = vld [vmem:[%s1175_s1 + $0x40] sm:$0xff] }
  0x14   :  { %466 = vmatpush.bf16.msra.mxu2 %v875_v18  ;;  %v882_v23 = vld [vmem:[%s1175_s1 + $0xd0] sm:$0xff]  ;;  %v873_v26 = vld [vmem:[%s1175_s1 + $0x88] sm:$0xff]  ;;  %v22_v30 = vld [vmem:[%s1174_s0] sm:$0xff] }
  0x15   :  { %479 = vmatpush.bf16.msra.mxu3 %v883_v19  ;;  %v881_v28 = vld [vmem:[%s1175_s1 + $0xc8] sm:$0xff]  ;;  %v895_v32 = vld [vmem:[%s1175_s1 + $0x138] sm:$0xff]  ;;  %v872_v34 = vld [vmem:[%s1175_s1 + $0x80] sm:$0xff]  ;;  %v29_v36 = vpack.c.bf16 %v22_v30, %v22_v30 }
  0x16   :  { %441 = vmatpush.bf16.msra.mxu0 %v858_v20  ;;  %v23_v31 = vld [vmem:[%s1174_s0 + $0x8] sm:$0xff]  ;;  %v903_v33 = vld [vmem:[%s1175_s1 + $0x178] sm:$0xff]  ;;  %v24_v35 = vld [vmem:[%s1174_s0 + $0x10] sm:$0xff] }
  0x17   :  { %454 = vmatpush.bf16.msra.mxu1 %v866_v21  ;;  %v30_v37 = vpack.c.bf16 %v23_v31, %v23_v31  ;;  %v880_v38 = vld [vmem:[%s1175_s1 + $0xc0] sm:$0xff]  ;;  %v25_v40 = vld [vmem:[%s1174_s0 + $0x18] sm:$0xff]  ;;  %v894_v41 = vld [vmem:[%s1175_s1 + $0x130] sm:$0xff]  ;;  %v31_v43 = vpack.c.bf16 %v24_v35, %v24_v35 }
  0x18   :  { %467 = vmatpush.bf16.msra.mxu2 %v874_v22  ;;  %v904_v39 = vld [vmem:[%s1175_s1 + $0x180] sm:$0xff]  ;;  %v902_v42 = vld [vmem:[%s1175_s1 + $0x170] sm:$0xff]  ;;  %v32_v44 = vpack.c.bf16 %v25_v40, %v25_v40  ;;  %v893_v45 = vld [vmem:[%s1175_s1 + $0x128] sm:$0xff] }
  0x19   :  { %480 = vmatpush.bf16.msra.mxu3 %v882_v23  ;;  %v901_v46 = vld [vmem:[%s1175_s1 + $0x168] sm:$0xff]  ;;  %v892_v47 = vld [vmem:[%s1175_s1 + $0x120] sm:$0xff]  ;;  %v891_v49 = vld [vmem:[%s1175_s1 + $0x118] sm:$0xff] }
  0x1a   :  { %442 = vmatpush.bf16.msra.mxu0 %v857_v24  ;;  %v900_v48 = vld [vmem:[%s1175_s1 + $0x160] sm:$0xff]  ;;  %v899_v50 = vld [vmem:[%s1175_s1 + $0x158] sm:$0xff]  ;;  %v28_v51 = vld [vmem:[%s1174_s0 + $0x30] sm:$0xff] }
  0x1b   :  { %455 = vmatpush.bf16.msra.mxu1 %v865_v25  ;;  %v890_v52 = vld [vmem:[%s1175_s1 + $0x110] sm:$0xff]  ;;  %v35_v54 = vpack.c.bf16 %v28_v51, %v28_v51  ;;  %v889_v55 = vld [vmem:[%s1175_s1 + $0x108] sm:$0xff]  ;;  %v888_v57 = vld [vmem:[%s1175_s1 + $0x100] sm:$0xff] }
  0x1c   :  { %468 = vmatpush.bf16.msra.mxu2 %v873_v26  ;;  %v898_v53 = vld [vmem:[%s1175_s1 + $0x150] sm:$0xff]  ;;  %v897_v56 = vld [vmem:[%s1175_s1 + $0x148] sm:$0xff]  ;;  %v896_v58 = vld [vmem:[%s1175_s1 + $0x140] sm:$0xff] }
  0x1d   :  { %481 = vmatpush.bf16.msra.mxu3 %v881_v28  ;;  %v26_v59 = vld [vmem:[%s1174_s0 + $0x20] sm:$0xff]  ;;  %v27_v60 = vld [vmem:[%s1174_s0 + $0x28] sm:$0xff]  ;;  %v912_v63 = vld [vmem:[%s1177_s3 + $0x38] sm:$0xff] }
  0x1e   :  { %443 = vmatpush.bf16.msra.mxu0 %v856_v27  ;;  %v33_v61 = vpack.c.bf16 %v26_v59, %v26_v59  ;;  %v34_v62 = vpack.c.bf16 %v27_v60, %v27_v60  ;;  %v911_v0 = vld [vmem:[%s1177_s3 + $0x30] sm:$0xff]  ;;  %v910_v1 = vld [vmem:[%s1177_s3 + $0x28] sm:$0xff]  ;;  %v909_v2 = vld [vmem:[%s1177_s3 + $0x20] sm:$0xff] }
  0x1f   :  { %456 = vmatpush.bf16.msra.mxu1 %v864_v29  ;;  %v908_v3 = vld [vmem:[%s1177_s3 + $0x18] sm:$0xff]  ;;  %v907_v4 = vld [vmem:[%s1177_s3 + $0x10] sm:$0xff]  ;;  %v906_v5 = vld [vmem:[%s1177_s3 + $0x8] sm:$0xff] }
  0x20   :  { %469 = vmatpush.bf16.msra.mxu2 %v872_v34  ;;  %v905_v8 = vld [vmem:[%s1177_s3] sm:$0xff] }
  0x21   :  { %444 = vmatmul.bf16.vlgmr.msra.gmra.mxu0 %v29_v36  ;;  %482 = vmatpush.bf16.msra.mxu3 %v880_v38  ;;  %v914_v13 = vld [vmem:[%s1176_s2] ss:$0 sm:$0xff] }
  0x22   :  { %488 = vmatpush.bf16.msrb.mxu0 %v895_v32  ;;  %457 = vmatmul.bf16.vlgmr.msra.gmra.mxu1 %v30_v37  ;;  %v915_v31 = vld [vmem:[%s1178_s4] ss:$0 sm:$0xff] }
  0x23   :  { %501 = vmatpush.bf16.msrb.mxu1 %v903_v33  ;;  %470 = vmatmul.bf16.vlgmr.msra.gmra.mxu2 %v31_v43 }
  0x24   :  { %521 = vmatpush.bf16.msrb.mxu2 %v904_v39  ;;  %483 = vmatmul.bf16.vlgmr.msra.gmra.mxu3 %v32_v44 }
  0x25   :  { %597 = vmatpush.bf16.msrb.mxu3 %v912_v63 }
  0x26   :  { %489 = vmatpush.bf16.msrb.mxu0 %v894_v41 }
  0x27   :  { %502 = vmatpush.bf16.msrb.mxu1 %v902_v42 }
  0x29   :  { %598 = vmatpush.bf16.msrb.mxu3 %v911_v0 }
  0x2a   :  { %490 = vmatpush.bf16.msrb.mxu0 %v893_v45 }
  0x2b   :  { %503 = vmatpush.bf16.msrb.mxu1 %v901_v46 }
  0x2d   :  { %599 = vmatpush.bf16.msrb.mxu3 %v910_v1 }
  0x2e   :  { %491 = vmatpush.bf16.msrb.mxu0 %v892_v47 }
  0x2f   :  { %504 = vmatpush.bf16.msrb.mxu1 %v900_v48 }
  0x31   :  { %600 = vmatpush.bf16.msrb.mxu3 %v909_v2 }
  0x32   :  { %492 = vmatpush.bf16.msrb.mxu0 %v891_v49 }
  0x33   :  { %505 = vmatpush.bf16.msrb.mxu1 %v899_v50  ;;  %823 = vmatmul.msk.bf16.vlgmr.msrb.gmra.mxu2 %vm432_vm0, %v35_v54 }
  0x35   :  { %601 = vmatpush.bf16.msrb.mxu3 %v908_v3 }
  0x36   :  { %493 = vmatpush.bf16.msrb.mxu0 %v890_v52 }
  0x37   :  { %506 = vmatpush.bf16.msrb.mxu1 %v898_v53 }
  0x39   :  { %602 = vmatpush.bf16.msrb.mxu3 %v907_v4 }
  0x3a   :  { %494 = vmatpush.bf16.msrb.mxu0 %v889_v55 }
  0x3b   :  { %507 = vmatpush.bf16.msrb.mxu1 %v897_v56 }
  0x3d   :  { %603 = vmatpush.bf16.msrb.mxu3 %v906_v5 }
  0x3e   :  { %495 = vmatpush.bf16.msrb.mxu0 %v888_v57 }
  0x3f   :  { %508 = vmatpush.bf16.msrb.mxu1 %v896_v58 }
  0x41   :  { %496 = vmatmul.bf16.vlgmr.msrb.gmra.mxu0 %v33_v61  ;;  %604 = vmatpush.bf16.msrb.mxu3 %v905_v8 }
  0x42   :  { %509 = vmatmul.bf16.vlgmr.msrb.gmra.mxu1 %v34_v62 }
  0x9e   :  { %v445_v6 = vpop.f32.mrf.mxu0 }
  0x9f   :  { %v458_v7 = vpop.f32.mrf.mxu1  ;;  %v446_v14 = vadd.f32 %v914_v13, %v445_v6 }
  0xa1   :  { %v459_v17 = vadd.f32 %v458_v7, %v446_v14 }
  0xa6   :  { %v447_v9 = vpop.f32.mrf.mxu0  ;;  %v471_v11 = vpop.f32.mrf.mxu2 }
  0xa7   :  { %v460_v10 = vpop.f32.mrf.mxu1  ;;  %v484_v12 = vpop.f32.mrf.mxu3  ;;  %v472_v18 = vadd.f32 %v471_v11, %v459_v17 }
  0xa9   :  { %v485_v20 = vadd.f32 %v484_v12, %v472_v18 }
  0xae   :  { %v473_v15 = vpop.f32.mrf.mxu2 }
  0xaf   :  { %v486_v16 = vpop.f32.mrf.mxu3 }
  0xb6   :  { %v523_v19 = vpop.f32.mrf.mxu2 }
  0xbe   :  { %v497_v21 = vpop.f32.mrf.mxu0  ;;  %v525_v25 = vpop.f32.mrf.mxu2 }
  0xbf   :  { %v510_v22 = vpop.f32.mrf.mxu1  ;;  %v498_v23 = vadd.f32 %v497_v21, %v485_v20 }
  0xc1   :  { %v511_v24 = vadd.f32 %v510_v22, %v498_v23 }
  0xc3   :  { %v524_v26 = vadd.f32 %v523_v19, %v511_v24 }
  0xc5   :  { %v527_v27 = vmax.f32 %v524_v26, 0.0 }
  0xc6   :  { %v499_v28 = vpop.f32.mrf.mxu0 }
  0xc7   :  { %v512_v29 = vpop.f32.mrf.mxu1  ;;  %v528_v30 = vpack.c.bf16 %v527_v27, %v527_v27 }
  0xc9   :  { %605 = vmatmul.bf16.vlgmr.msrb.gmra.mxu3 %v528_v30 }
 0x14c   :  { %v606_v32 = vpop.f32.mrf.mxu3 }
 0x14d   :  { %v607_v33 = vadd.f32 %v915_v31, %v606_v32 }
 0x14f   :  { %610 = vst [vmem:[#allocation2] sm:$0xff] %v607_v33 }
 0x150   :  { %621 = dma.vmem_to_hbm [thread:$0]  %s617_s22, 128, %s619_s25, [#allocation3]  }
 0x154   :  { %v608_v34 = vpop.f32.mrf.mxu3 }
 0x155   :  { %940 = dma.done.wait [#allocation3], 128  }
 0x156   :  { %941 = vsyncadd [#allocation3], 4294967168 }
 0x157   :  { %626 = vsyncpa [#allocation3], 1 }

</bundles_post_ra>
